<compile_context>
chip_gen: v6e
topology: v6e:2x2x1
jax: 0.10.0
libtpu: 0.0.40
codegen_flags: <defaults>
</compile_context>

<pallas_src>
import jax
import jax.numpy as jnp
from jax.experimental import pallas as pl
from jax.experimental.pallas import tpu as pltpu

# Sobel taps from the PyTorch module (F.conv2d = cross-correlation, no flip).
V_KERNEL = ((-1.0, 0.0, 1.0), (-2.0, 0.0, 2.0), (-1.0, 0.0, 1.0))
H_KERNEL = ((1.0, 2.0, 1.0), (0.0, 0.0, 0.0), (-1.0, -2.0, -1.0))


def _tile_partials(out, lab, top, bot):
    """Per-tile Sobel magnitude * log_softmax partials.

    out, lab: [N, TH, W] f32 tiles.  top/bot: [N, 1, W] conv halo rows
    (already zeroed at the true image border; padding=1 semantics).
    Returns (sum(gm * log_softmax(out, axis=0)), max(gm)) as f32 scalars.
    NOTE: the full batch N must be present in every tile — log_softmax is
    over dim 0.  Do not tile over N.
    """
    n, th, w = lab.shape

    # --- separable Sobel, vertical pass (sublane concat with halo rows) -----
    up = jnp.concatenate([top, lab[:, :th - 1, :]], axis=1)   # L(y-1, x)
    dn = jnp.concatenate([lab[:, 1:, :], bot], axis=1)        # L(y+1, x)
    s = up + lab + lab + dn                                   # up + 2*mid + dn
    d = up - dn

    # --- horizontal pass: lane shift via zero-column concat -----------------
    # The zero column doubles as the padding=1 border, so no iota/masks.
    zc = jnp.zeros((n, th, 1), jnp.float32)
    s_xm1 = jnp.concatenate([zc, s[:, :, :w - 1]], axis=2)    # s(x-1)
    s_xp1 = jnp.concatenate([s[:, :, 1:], zc], axis=2)        # s(x+1)
    d_xm1 = jnp.concatenate([zc, d[:, :, :w - 1]], axis=2)
    d_xp1 = jnp.concatenate([d[:, :, 1:], zc], axis=2)

    gx = s_xp1 - s_xm1
    gy = d_xm1 + d + d + d_xp1
    gm = jnp.sqrt(gx * gx + gy * gy)

    # --- log_softmax over the batch axis (dim 0), fully inside the tile -----
    m = jnp.max(out, axis=0, keepdims=True)
    shifted = out - m
    lse = jnp.log(jnp.sum(jnp.exp(shifted), axis=0, keepdims=True))
    log_sm = shifted - lse

    return jnp.sum(gm * log_sm), jnp.max(gm)


def _sobel_tile_kernel(out_ref, lab_ref, halo_up_ref, halo_dn_ref,
                       psum_ref, pmax_ref):
    """Multi-tile path: grid over H, 8-row neighbor blocks supply the halo."""
    i = pl.program_id(0)
    n_tiles = pl.num_programs(0)

    lab = lab_ref[...].astype(jnp.float32)                    # [N, TH, W]
    hb = halo_up_ref.shape[1]

    top = halo_up_ref[:, hb - 1:hb, :].astype(jnp.float32)    # row  i*TH - 1
    bot = halo_dn_ref[:, 0:1, :].astype(jnp.float32)          # row (i+1)*TH
    # padding=1: zero the halo at the true image border.
    top = jnp.where(i == 0, jnp.zeros_like(top), top)
    bot = jnp.where(i == n_tiles - 1, jnp.zeros_like(bot), bot)

    part_sum, part_max = _tile_partials(out_ref[...].astype(jnp.float32),
                                        lab, top, bot)
    psum_ref[0, 0] = part_sum
    pmax_ref[0, 0] = part_max


def _sobel_single_kernel(out_ref, lab_ref, psum_ref, pmax_ref):
    """Single-tile path: whole image in one block, zero halo rows."""
    lab = lab_ref[...].astype(jnp.float32)
    n, _, w = lab.shape
    zrow = jnp.zeros((n, 1, w), jnp.float32)
    part_sum, part_max = _tile_partials(out_ref[...].astype(jnp.float32),
                                        lab, zrow, zrow)
    psum_ref[0, 0] = part_sum
    pmax_ref[0, 0] = part_max


def _vmem_limit_bytes():
    """Per-generation scoped-VMEM limit (leaves ~25% headroom)."""
    try:
        cap = int(pltpu.get_tpu_info().vmem_capacity_bytes)
    except Exception:
        cap = 64 * 1024 * 1024          # v7x-safe fallback
    return max(32 * 1024 * 1024, min(cap * 3 // 4, 100 * 1024 * 1024))


def _pick_tile_h(H, N, W, budget_bytes):
    """Largest multiple-of-8 divisor of H whose [N, TH, W] f32 block fits."""
    if H % 8 != 0:
        return H                        # single-tile fallback (no 8-row halo)
    bytes_per_row = max(N * W, 1) * 4
    max_rows = max(8, budget_bytes // bytes_per_row)
    if H <= max_rows:
        return H
    best = 8                            # 8 always divides H here (v7x-safe)
    for t in range(8, H, 8):
        if H % t == 0 and t <= max_rows:
            best = t
    return best


def sobel_loss(outputs, labels, alpha, *, tile_h=None):
    """outputs, labels: [N, 1, H, W] float32 (NCHW, single channel)."""
    N, C, H, W = outputs.shape
    assert C == 1, "SobelLoss conv kernels have in_channels=1"
    assert labels.shape == outputs.shape
    out3 = outputs.reshape(N, H, W).astype(jnp.float32)
    lab3 = labels.reshape(N, H, W).astype(jnp.float32)

    vmem_limit = _vmem_limit_bytes()
    budget = vmem_limit // 16           # ~10-12 live temps + 2x2 input buffers
    TH = tile_h if tile_h is not None else _pick_tile_h(H, N, W, budget)
    if H % TH != 0 or (TH != H and TH % 8 != 0):
        TH = H                          # safe fallback: single tile
    n_tiles = H // TH

    cparams = pltpu.CompilerParams(
        dimension_semantics=("parallel",),   # megacore-shardable on v7x
        vmem_limit_bytes=vmem_limit,
    )
    part_shapes = (jax.ShapeDtypeStruct((n_tiles, 1), jnp.float32),
                   jax.ShapeDtypeStruct((n_tiles, 1), jnp.float32))

    def smem_out():
        return pl.BlockSpec((1, 1), lambda i: (i, 0),
                            memory_space=pltpu.MemorySpace.SMEM)

    if n_tiles == 1:
        # Single tile: no halo inputs, labels are DMA'd exactly once.
        grid_spec = pltpu.PrefetchScalarGridSpec(
            num_scalar_prefetch=0,
            grid=(1,),
            in_specs=[pl.BlockSpec((N, H, W), lambda i: (0, 0, 0)),
                      pl.BlockSpec((N, H, W), lambda i: (0, 0, 0))],
            out_specs=(smem_out(), smem_out()),
        )
        psum, pmax = pl.pallas_call(
            _sobel_single_kernel, out_shape=part_shapes,
            grid_spec=grid_spec, compiler_params=cparams,
        )(out3, lab3)
    else:
        thb = TH // 8                    # halo-block stride (8-row blocks)
        hb_blocks = H // 8
        grid_spec = pltpu.PrefetchScalarGridSpec(
            num_scalar_prefetch=0,
            grid=(n_tiles,),
            in_specs=[
                # outputs / labels tiles: rows [i*TH, (i+1)*TH)
                pl.BlockSpec((N, TH, W), lambda i: (0, i, 0)),
                pl.BlockSpec((N, TH, W), lambda i: (0, i, 0)),
                # small neighbor blocks supplying the +-1 row conv halo
                # (clamped at the image border; zeroed in-kernel there)
                pl.BlockSpec((N, 8, W),
                             lambda i: (0, jnp.maximum(i * thb - 1, 0), 0)),
                pl.BlockSpec((N, 8, W),
                             lambda i: (0, jnp.minimum((i + 1) * thb,
                                                       hb_blocks - 1), 0)),
            ],
            out_specs=(smem_out(), smem_out()),
        )
        psum, pmax = pl.pallas_call(
            _sobel_tile_kernel, out_shape=part_shapes,
            grid_spec=grid_spec, compiler_params=cparams,
        )(out3, lab3, lab3, lab3)

    # Deferred normalization: mean(-(gm / max(gm)) * alpha * log_softmax).
    # NOTE: if gm is identically zero, this divides by zero — same behavior
    # as the PyTorch reference (gm /= gm.max()).
    total = jnp.float32(N * H * W)
    return -(jnp.float32(alpha) * jnp.sum(psum)) / (jnp.max(pmax) * total)


def _sobel_loss_ref(outputs, labels, alpha):
    """Pure-JAX reference matching the PyTorch forward (direct 9-tap conv)."""
    N, C, H, W = outputs.shape
    out3 = outputs.reshape(N, H, W).astype(jnp.float32)
    lab_pad = jnp.pad(labels.reshape(N, H, W).astype(jnp.float32),
                      ((0, 0), (1, 1), (1, 1)))
    gx = jnp.zeros((N, H, W), jnp.float32)
    gy = jnp.zeros((N, H, W), jnp.float32)
    for ky in range(3):
        for kx in range(3):
            tap = lab_pad[:, ky:ky + H, kx:kx + W]
            gx = gx + V_KERNEL[ky][kx] * tap
            gy = gy + H_KERNEL[ky][kx] * tap
    gm = jnp.sqrt(gx * gx + gy * gy)
    gm = gm / jnp.max(gm)
    log_sm = jax.nn.log_softmax(out3, axis=0)
    return jnp.mean(-(gm * alpha) * log_sm)


if __name__ == "__main__":
    key = jax.random.PRNGKey(0)
    k1, k2 = jax.random.split(key)
    N, C, H, W = 2, 1, 32, 16
    alpha = 0.5

    outputs = jax.random.normal(k1, (N, C, H, W), dtype=jnp.float32)
    labels = jax.random.uniform(k2, (N, C, H, W), dtype=jnp.float32)

    ref = jax.block_until_ready(_sobel_loss_ref(outputs, labels, alpha))

    # Single-tile path (auto tile size) and multi-tile path (grid over H with
    # row halos + per-tile partial outputs) — both must match the reference.
    loss_auto = jax.block_until_ready(sobel_loss(outputs, labels, alpha))
    loss_tiled = jax.block_until_ready(sobel_loss(outputs, labels, alpha, tile_h=8))

    for loss in (loss_auto, loss_tiled):
        assert jnp.isfinite(loss), "loss is not finite"
        assert jnp.allclose(loss, ref, rtol=1e-5, atol=1e-5), (loss, ref)
    print("KERNEL_OK")
</pallas_src>

<mosaic_0001>
module attributes {stable_mosaic.version = 11 : i64} {
  func.func @_sobel_single_kernel(%arg0: i32, %arg1: memref<2x32x16xf32, #tpu.memory_space<vmem>>, %arg2: memref<2x32x16xf32, #tpu.memory_space<vmem>>, %arg3: memref<1x1xf32, #tpu.memory_space<smem>>, %arg4: memref<1x1xf32, #tpu.memory_space<smem>>) attributes {dimension_semantics = [#tpu.dimension_semantics<parallel>], iteration_bounds = array<i64: 1>, scalar_prefetch = 0 : i64, scratch_operands = 0 : i64, tpu.core_type = #tpu.core_type<tc>, window_params = [{pipeline_mode = #tpu.pipeline_mode<synchronous>, transform_indices = @transform_0, window_bounds = array<i64: 2, 32, 16>}, {pipeline_mode = #tpu.pipeline_mode<synchronous>, transform_indices = @transform_1, window_bounds = array<i64: 2, 32, 16>}, {transform_indices = @transform_2, window_bounds = array<i64: 1, 1>}, {transform_indices = @transform_3, window_bounds = array<i64: 1, 1>}]} {
    %c0 = arith.constant 0 : index
    %c0_0 = arith.constant 0 : index
    %c0_1 = arith.constant 0 : index
    %0 = vector.load %arg2[%c0, %c0_0, %c0_1] : memref<2x32x16xf32, #tpu.memory_space<vmem>>, vector<2x32x16xf32>
    %cst = arith.constant 0.000000e+00 : f32
    %1 = vector.broadcast %cst : f32 to vector<2x1x16xf32>
    %c0_2 = arith.constant 0 : index
    %c0_3 = arith.constant 0 : index
    %c0_4 = arith.constant 0 : index
    %2 = vector.load %arg1[%c0_2, %c0_3, %c0_4] : memref<2x32x16xf32, #tpu.memory_space<vmem>>, vector<2x32x16xf32>
    %3 = vector.extract_strided_slice %0 {offsets = [0, 0, 0], sizes = [2, 31, 16], strides = [1, 1, 1]} : vector<2x32x16xf32> to vector<2x31x16xf32>
    %4 = tpu.concatenate %1, %3 in 1 : vector<2x1x16xf32>, vector<2x31x16xf32> -> vector<2x32x16xf32>
    %5 = vector.extract_strided_slice %0 {offsets = [0, 1, 0], sizes = [2, 31, 16], strides = [1, 1, 1]} : vector<2x32x16xf32> to vector<2x31x16xf32>
    %6 = tpu.concatenate %5, %1 in 1 : vector<2x31x16xf32>, vector<2x1x16xf32> -> vector<2x32x16xf32>
    %7 = arith.addf %4, %0 : vector<2x32x16xf32>
    %8 = arith.addf %7, %0 : vector<2x32x16xf32>
    %9 = arith.addf %8, %6 : vector<2x32x16xf32>
    %10 = arith.subf %4, %6 : vector<2x32x16xf32>
    %cst_5 = arith.constant 0.000000e+00 : f32
    %11 = vector.broadcast %cst_5 : f32 to vector<2x32x1xf32>
    %12 = vector.extract_strided_slice %9 {offsets = [0, 0, 0], sizes = [2, 32, 15], strides = [1, 1, 1]} : vector<2x32x16xf32> to vector<2x32x15xf32>
    %13 = tpu.concatenate %11, %12 in 2 : vector<2x32x1xf32>, vector<2x32x15xf32> -> vector<2x32x16xf32>
    %14 = vector.extract_strided_slice %9 {offsets = [0, 0, 1], sizes = [2, 32, 15], strides = [1, 1, 1]} : vector<2x32x16xf32> to vector<2x32x15xf32>
    %15 = tpu.concatenate %14, %11 in 2 : vector<2x32x15xf32>, vector<2x32x1xf32> -> vector<2x32x16xf32>
    %16 = vector.extract_strided_slice %10 {offsets = [0, 0, 0], sizes = [2, 32, 15], strides = [1, 1, 1]} : vector<2x32x16xf32> to vector<2x32x15xf32>
    %17 = tpu.concatenate %11, %16 in 2 : vector<2x32x1xf32>, vector<2x32x15xf32> -> vector<2x32x16xf32>
    %18 = vector.extract_strided_slice %10 {offsets = [0, 0, 1], sizes = [2, 32, 15], strides = [1, 1, 1]} : vector<2x32x16xf32> to vector<2x32x15xf32>
    %19 = tpu.concatenate %18, %11 in 2 : vector<2x32x15xf32>, vector<2x32x1xf32> -> vector<2x32x16xf32>
    %20 = arith.subf %15, %13 : vector<2x32x16xf32>
    %21 = arith.addf %17, %10 : vector<2x32x16xf32>
    %22 = arith.addf %21, %10 : vector<2x32x16xf32>
    %23 = arith.addf %22, %19 : vector<2x32x16xf32>
    %24 = arith.mulf %20, %20 : vector<2x32x16xf32>
    %25 = arith.mulf %23, %23 : vector<2x32x16xf32>
    %26 = arith.addf %24, %25 : vector<2x32x16xf32>
    %27 = math.sqrt %26 : vector<2x32x16xf32>
    %cst_6 = arith.constant dense<0xFF800000> : vector<32x16xf32>
    %28 = vector.multi_reduction <maximumf>, %2, %cst_6 [0] : vector<2x32x16xf32> to vector<32x16xf32>
    %29 = vector.shape_cast %28 : vector<32x16xf32> to vector<1x32x16xf32>
    %30 = vector.broadcast %29 : vector<1x32x16xf32> to vector<2x32x16xf32>
    %31 = arith.subf %2, %30 : vector<2x32x16xf32>
    %32 = math.exp %31 : vector<2x32x16xf32>
    %cst_7 = arith.constant dense<0.000000e+00> : vector<32x16xf32>
    %33 = vector.multi_reduction <add>, %32, %cst_7 [0] : vector<2x32x16xf32> to vector<32x16xf32>
    %34 = vector.shape_cast %33 : vector<32x16xf32> to vector<1x32x16xf32>
    %35 = math.log %34 : vector<1x32x16xf32>
    %36 = vector.broadcast %35 : vector<1x32x16xf32> to vector<2x32x16xf32>
    %37 = arith.subf %31, %36 : vector<2x32x16xf32>
    %38 = arith.mulf %27, %37 : vector<2x32x16xf32>
    %39 = vector.shape_cast %38 : vector<2x32x16xf32> to vector<1x2x32x16xf32>
    %cst_8 = arith.constant dense<0.000000e+00> : vector<1xf32>
    %40 = vector.multi_reduction <add>, %39, %cst_8 [1, 2, 3] : vector<1x2x32x16xf32> to vector<1xf32>
    %41 = vector.shape_cast %40 : vector<1xf32> to vector<1x1x1x1xf32>
    %42 = vector.extract %41[0, 0, 0, 0] : f32 from vector<1x1x1x1xf32>
    %43 = vector.shape_cast %27 : vector<2x32x16xf32> to vector<1x2x32x16xf32>
    %cst_9 = arith.constant dense<0xFF800000> : vector<1xf32>
    %44 = vector.multi_reduction <maximumf>, %43, %cst_9 [1, 2, 3] : vector<1x2x32x16xf32> to vector<1xf32>
    %45 = vector.shape_cast %44 : vector<1xf32> to vector<1x1x1x1xf32>
    %46 = vector.extract %45[0, 0, 0, 0] : f32 from vector<1x1x1x1xf32>
    %c0_10 = arith.constant 0 : index
    %c0_11 = arith.constant 0 : index
    %47 = memref.load %arg3[%c0_10, %c0_11] : memref<1x1xf32, #tpu.memory_space<smem>>
    memref.store %42, %arg3[%c0_10, %c0_11] : memref<1x1xf32, #tpu.memory_space<smem>>
    %c0_12 = arith.constant 0 : index
    %c0_13 = arith.constant 0 : index
    %48 = memref.load %arg4[%c0_12, %c0_13] : memref<1x1xf32, #tpu.memory_space<smem>>
    memref.store %46, %arg4[%c0_12, %c0_13] : memref<1x1xf32, #tpu.memory_space<smem>>
    return
  }
  func.func @transform_0(%arg0: i32) -> (i32, i32, i32) {
    %c0_i32 = arith.constant 0 : i32
    %c0_i32_0 = arith.constant 0 : i32
    %c0_i32_1 = arith.constant 0 : i32
    %c0_i32_2 = arith.constant 0 : i32
    return %c0_i32, %c0_i32_0, %c0_i32_1 : i32, i32, i32
  }
  func.func @transform_1(%arg0: i32) -> (i32, i32, i32) {
    %c0_i32 = arith.constant 0 : i32
    %c0_i32_0 = arith.constant 0 : i32
    %c0_i32_1 = arith.constant 0 : i32
    %c0_i32_2 = arith.constant 0 : i32
    return %c0_i32, %c0_i32_0, %c0_i32_1 : i32, i32, i32
  }
  func.func @transform_2(%arg0: i32) -> (i32, i32) {
    %c0_i32 = arith.constant 0 : i32
    %c0_i32_0 = arith.constant 0 : i32
    return %arg0, %c0_i32 : i32, i32
  }
  func.func @transform_3(%arg0: i32) -> (i32, i32) {
    %c0_i32 = arith.constant 0 : i32
    %c0_i32_0 = arith.constant 0 : i32
    return %arg0, %c0_i32 : i32, i32
  }
}

</mosaic_0001>

<bundles_post_ra>
// kernel: tpu_custom_call.1
= control target key start
LH: loop header
LB: loop body
LE: loop exit
PB: predicated region body
PF: predicated region fallthrough
CT: control target
= control target key end

     0   :  { %9 = vsyncpa [#allocation3], 0  ;;  %vm39_vm0 = vcmask 1040384   ;;  %vm64_vm1 = vcmask 1046528   ;;  %s953_s0 = inlined_call_operand.vmem [shape: f32[2,32,16], index: 0, kind: input, shape index: {}]   ;;  %s954_s1 = inlined_call_operand.vmem [shape: f32[2,32,16], index: 1, kind: input, shape index: {}]   ;;  %s955_s2 = inlined_call_operand.hbm [shape: f32[1,1], index: 2, kind: output, shape index: {0}]   ;;  %s956_s3 = inlined_call_operand.hbm [shape: f32[1,1], index: 3, kind: output, shape index: {1}]  }
   0x1   :  { %v16_v0 = vld [vmem:[%s954_s1 + $0x8] sm:$0xff]  ;;  %v17_v1 = vld [vmem:[%s954_s1 + $0x10] sm:$0xff]  ;;  %v18_v2 = vld [vmem:[%s954_s1 + $0x18] sm:$0xff] }
   0x2   :  { %v41_v3 = vrot.slane %v16_v0, 7  ;;  %v43_v4 = vrot.slane %v17_v1, 7  ;;  %v68_v5 = vrot.slane %v17_v1, 1  ;;  %v70_v6 = vrot.slane %v18_v2, 1  ;;  %v15_v7 = vld [vmem:[%s954_s1] sm:$0xff] }
   0x3   :  { %v40_v8 = vrot.slane %v15_v7, 7  ;;  %v65_v9 = vrot.slane %v15_v7, 1  ;;  %v66_v10 = vrot.slane %v16_v0, 1 }
   0x4   :  { %v44_v11 = vsel %vm39_vm0, %v41_v3, %v43_v4  ;;  %v71_v12 = vsel %vm64_vm1, %v68_v5, %v70_v6 }
   0x5   :  { %v635_v13 = vsub.f32 %v44_v11, %v71_v12  ;;  %v62_v14 = vsel %vm39_vm0, 0.0, %v40_v8  ;;  %v67_v15 = vsel %vm64_vm1, %v65_v9, %v66_v10  ;;  %v42_v16 = vsel %vm39_vm0, %v40_v8, %v41_v3 }
   0x6   :  { %v640_v17 = vsub.f32 %v62_v14, %v67_v15  ;;  %v89_v18 = vadd.f32 %v62_v14, %v15_v7  ;;  %v69_v19 = vsel %vm64_vm1, %v66_v10, %v68_v5  ;;  %v90_v20 = vadd.f32 %v42_v16, %v16_v0 }
   0x7   :  { %10 = vsyncpa [#allocation5], 0  ;;  %s597_s20 = smov 1   ;;  %v647_v22 = vsub.f32 %v42_v16, %v69_v19  ;;  %v45_v24 = vrot.slane %v18_v2, 7  ;;  %v87_v28 = vsel %vm64_vm1, %v70_v6, 0.0  ;;  %s598_s21 = smov 127   ;;  %v91_v30 = vadd.f32 %v44_v11, %v17_v1 }
   0x8   :  { %207 = vrot.lane.b32.xlu1 %v635_v13, %s597_s20  ;;  %203 = vrot.lane.b32.xlu0 %v640_v17, %s597_s20  ;;  %v97_v21 = vadd.f32 %v89_v18, %v15_v7  ;;  %v98_v23 = vadd.f32 %v90_v20, %v16_v0  ;;  %v19_v31 = vld [vmem:[%s954_s1 + $0x20] sm:$0xff]  ;;  %v20_v32 = vld [vmem:[%s954_s1 + $0x28] sm:$0xff]  ;;  %vm379_vm2 = vcmask 130048   ;;  %vm153_vm3 = vcmask 7168   ;;  %s599_s19 = smov [#allocation2]   ;;  %s600_s22 = smov [#allocation4]  }
   0x9   :  { %v46_v27 = vsel %vm39_vm0, %v43_v4, %v45_v24  ;;  %v99_v33 = vadd.f32 %v91_v30, %v17_v1  ;;  %v47_v34 = vrot.slane %v19_v31, 7  ;;  %v72_v35 = vrot.slane %v19_v31, 1  ;;  %v21_v41 = vld [vmem:[%s954_s1 + $0x30] sm:$0xff]  ;;  %v22_v50 = vld [vmem:[%s954_s1 + $0x38] sm:$0xff]  ;;  %v23_v8 = vld [vmem:[%s953_s0] sm:$0xff] }
   0xa   :  { %v105_v25 = vadd.f32 %v97_v21, %v67_v15  ;;  %v106_v26 = vadd.f32 %v98_v23, %v69_v19  ;;  %v656_v29 = vsub.f32 %v46_v27, %v87_v28  ;;  %v73_v36 = vrot.slane %v20_v32, 1  ;;  %v27_v9 = vld [vmem:[%s953_s0 + $0x20] sm:$0xff]  ;;  %v24_v10 = vld [vmem:[%s953_s0 + $0x8] sm:$0xff]  ;;  %v29_v14 = vld [vmem:[%s953_s0 + $0x30] sm:$0xff] }
   0xb   :  { %v107_v37 = vadd.f32 %v99_v33, %v71_v12  ;;  %v92_v38 = vadd.f32 %v46_v27, %v18_v2  ;;  %v63_v39 = vsel %vm39_vm0, 0.0, %v47_v34  ;;  %v48_v44 = vrot.slane %v20_v32, 7  ;;  %v28_v11 = vld [vmem:[%s953_s0 + $0x28] sm:$0xff]  ;;  %v25_v12 = vld [vmem:[%s953_s0 + $0x10] sm:$0xff]  ;;  %v30_v30 = vld [vmem:[%s953_s0 + $0x38] sm:$0xff] }
   0xc   :  { %129 = vrot.lane.b32.xlu1 %v105_v25, %s597_s20  ;;  %205 = vrot.lane.b32.xlu0 %v647_v22, %s597_s20  ;;  %v74_v40 = vsel %vm64_vm1, %v72_v35, %v73_v36  ;;  %v75_v45 = vrot.slane %v21_v41, 1  ;;  %v93_v47 = vadd.f32 %v63_v39, %v19_v31  ;;  %v50_v53 = vrot.slane %v21_v41, 7 }
   0xd   :  { %v678_v42 = vsub.f32 %v63_v39, %v74_v40  ;;  %v100_v43 = vadd.f32 %v92_v38, %v18_v2  ;;  %v49_v48 = vsel %vm39_vm0, %v47_v34, %v48_v44  ;;  %v52_v54 = vrot.slane %v22_v50, 7 }
   0xe   :  { %v76_v49 = vsel %vm64_vm1, %v73_v36, %v75_v45  ;;  %v101_v52 = vadd.f32 %v93_v47, %v19_v31  ;;  %v77_v55 = vrot.slane %v22_v50, 1  ;;  %v94_v57 = vadd.f32 %v49_v48, %v20_v32 }
   0xf   :  { %v108_v46 = vadd.f32 %v100_v43, %v87_v28  ;;  %v691_v51 = vsub.f32 %v49_v48, %v76_v49  ;;  %v53_v58 = vsel %vm39_vm0, %v50_v53, %v52_v54  ;;  %v51_v60 = vsel %vm39_vm0, %v48_v44, %v50_v53  ;;  %v26_v28 = vld [vmem:[%s953_s0 + $0x18] sm:$0xff] }
  0x10   :  { %162 = vrot.lane.b32.xlu1 %v105_v25, %s598_s21  ;;  %131 = vrot.lane.b32.xlu0 %v106_v26, %s597_s20  ;;  %v109_v56 = vadd.f32 %v101_v52, %v74_v40  ;;  %v88_v59 = vsel %vm64_vm1, %v77_v55, 0.0  ;;  %v78_v61 = vsel %vm64_vm1, %v75_v45, %v77_v55  ;;  %v102_v0 = vadd.f32 %v94_v57, %v20_v32 }
  0x11   :  { %v703_v62 = vsub.f32 %v53_v58, %v88_v59  ;;  %v705_v63 = vsub.f32 %v51_v60, %v78_v61  ;;  %v96_v2 = vadd.f32 %v53_v58, %v22_v50  ;;  %v95_v3 = vadd.f32 %v51_v60, %v21_v41 }
  0x12   :  { %v110_v1 = vadd.f32 %v102_v0, %v76_v49  ;;  %v380_v15 = vsel %vm379_vm2, %v23_v8, -inf  ;;  %v381_v16 = vsel %vm379_vm2, %v27_v9, -inf  ;;  %v383_v18 = vsel %vm379_vm2, %v24_v10, -inf }
  0x13   :  { %v104_v4 = vadd.f32 %v96_v2, %v22_v50  ;;  %v103_v5 = vadd.f32 %v95_v3, %v21_v41  ;;  %v384_v19 = vsel %vm379_vm2, %v28_v11, -inf  ;;  %v386_v20 = vsel %vm379_vm2, %v25_v12, -inf }
  0x14   :  { %209 = vrot.lane.b32.xlu1 %v656_v29, %s597_s20  ;;  %164 = vrot.lane.b32.xlu0 %v106_v26, %s598_s21  ;;  %v387_v21 = vsel %vm379_vm2, %v29_v14, -inf  ;;  %v382_v24 = vmax.f32 %v380_v15, %v381_v16  ;;  %v385_v26 = vmax.f32 %v383_v18, %v384_v19  ;;  %v389_v36 = vsel %vm379_vm2, %v26_v28, -inf }
  0x15   :  { %v112_v6 = vadd.f32 %v104_v4, %v88_v59  ;;  %v111_v7 = vadd.f32 %v103_v5, %v78_v61  ;;  %v388_v27 = vmax.f32 %v386_v20, %v387_v21  ;;  %vm186_vm4 = vcmask 121856  }
  0x16   :  { %v755_v31 = vsub.f32 %v23_v8, %v382_v24  ;;  %v759_v34 = vsub.f32 %v24_v10, %v385_v26  ;;  %v765_v38 = vsub.f32 %v27_v9, %v382_v24  ;;  %v767_v39 = vsub.f32 %v28_v11, %v385_v26 }
  0x17   :  { %v761_v35 = vsub.f32 %v25_v12, %v388_v27  ;;  %v775_v48 = vsub.f32 %v29_v14, %v388_v27 }
  0x18   :  { %237 = vrot.lane.b32.xlu1 %v647_v22, %s598_s21  ;;  %235 = vrot.lane.b32.xlu0 %v640_v17, %s598_s21  ;;  %v400_v40 = vmul.f32 1.442695, %v755_v31  ;;  %v402_v44 = vmul.f32 1.442695, %v759_v34  ;;  %v408_v47 = vmul.f32 1.442695, %v765_v38 }
  0x19   :  { %v410_v49 = vmul.f32 1.442695, %v767_v39  ;;  %v412_v55 = vmul.f32 1.442695, %v775_v48 }
  0x1a   :  { %537 = vpow2.f32 %v400_v40 }
  0x1b   :  { %539 = vpow2.f32 %v402_v44 }
  0x1c   :  { %166 = vrot.lane.b32.xlu1 %v107_v37, %s598_s21  ;;  %133 = vrot.lane.b32.xlu0 %v107_v37, %s597_s20  ;;  %v390_v37 = vsel %vm379_vm2, %v30_v30, -inf }
  0x1d   :  { %v391_v45 = vmax.f32 %v389_v36, %v390_v37 }
  0x1f   :  { %v778_v53 = vsub.f32 %v26_v28, %v391_v45  ;;  %v780_v54 = vsub.f32 %v30_v30, %v391_v45 }
  0x20   :  { %239 = vrot.lane.b32.xlu1 %v635_v13, %s598_s21  ;;  %211 = vrot.lane.b32.xlu0 %v678_v42, %s597_s20 }
  0x21   :  { %v406_v58 = vmul.f32 1.442695, %v778_v53  ;;  %v414_v59 = vmul.f32 1.442695, %v780_v54 }
  0x24   :  { %168 = vrot.lane.b32.xlu1 %v108_v46, %s598_s21  ;;  %135 = vrot.lane.b32.xlu0 %v108_v46, %s597_s20  ;;  %v404_v46 = vmul.f32 1.442695, %v761_v35 }
  0x26   :  { %541 = vpow2.f32 %v404_v46 }
  0x27   :  { %543 = vpow2.f32 %v408_v47  ;;  %v538_v2 = vpop.eup %537 }
  0x28   :  { %241 = vrot.lane.b32.xlu1 %v656_v29, %s598_s21  ;;  %213 = vrot.lane.b32.xlu0 %v691_v51, %s597_s20  ;;  %545 = vpow2.f32 %v410_v49  ;;  %v540_v5 = vpop.eup %539  ;;  %v416_v21 = vsel %vm379_vm2, %v538_v2, 0.0 }
  0x29   :  { %547 = vpow2.f32 %v412_v55 }
  0x2a   :  { %549 = vpow2.f32 %v406_v58 }
  0x2b   :  { %551 = vpow2.f32 %v414_v59 }
  0x2c   :  { %170 = vrot.lane.b32.xlu1 %v109_v56, %s598_s21  ;;  %137 = vrot.lane.b32.xlu0 %v109_v56, %s597_s20 }
  0x30   :  { %217 = vrot.lane.b32.xlu1 %v703_v62, %s597_s20  ;;  %215 = vrot.lane.b32.xlu0 %v705_v63, %s597_s20 }
  0x33   :  { %v542_v8 = vpop.eup %541 }
  0x34   :  { %139 = vrot.lane.b32.xlu1 %v110_v1, %s597_s20  ;;  %243 = vrot.lane.b32.xlu0 %v678_v42, %s598_s21  ;;  %v544_v10 = vpop.eup %543  ;;  %v422_v27 = vsel %vm379_vm2, %v542_v8, 0.0 }
  0x35   :  { %v546_v11 = vpop.eup %545  ;;  %v417_v26 = vsel %vm379_vm2, %v544_v10, 0.0 }
  0x36   :  { %v420_v36 = vsel %vm379_vm2, %v546_v11, 0.0 }
  0x38   :  { %245 = vrot.lane.b32.xlu1 %v691_v51, %s598_s21  ;;  %172 = vrot.lane.b32.xlu0 %v110_v1, %s598_s21 }
  0x3c   :  { %143 = vrot.lane.b32.xlu1 %v112_v6, %s597_s20  ;;  %141 = vrot.lane.b32.xlu0 %v111_v7, %s597_s20 }
  0x40   :  { %176 = vrot.lane.b32.xlu1 %v112_v6, %s598_s21  ;;  %174 = vrot.lane.b32.xlu0 %v111_v7, %s598_s21 }
  0x44   :  { %249 = vrot.lane.b32.xlu1 %v703_v62, %s598_s21  ;;  %247 = vrot.lane.b32.xlu0 %v705_v63, %s598_s21 }
  0x7a   :  { %v208_v23 = vpop.permute.xlu1 %207  ;;  %v204_v25 = vpop.permute.xlu0 %203 }
  0x7b   :  { %v227_v0 = vsel %vm153_vm3, 0.0, %v204_v25  ;;  %v229_v6 = vsel %vm153_vm3, 0.0, %v208_v23  ;;  %v419_v23 = vsel %vm379_vm2, %v540_v5, 0.0 }
  0x7c   :  { %v275_v7 = vadd.f32 %v227_v0, %v640_v17  ;;  %v277_v12 = vadd.f32 %v229_v6, %v635_v13 }
  0x7e   :  { %v757_v32 = vpop.permute.xlu1 %129  ;;  %v206_v33 = vpop.permute.xlu0 %205  ;;  %v283_v20 = vadd.f32 %v275_v7, %v640_v17 }
  0x7f   :  { %v228_v1 = vsel %vm153_vm3, 0.0, %v206_v33  ;;  %v548_v17 = vpop.eup %547  ;;  %v154_v37 = vsel %vm153_vm3, 0.0, %v757_v32  ;;  %v418_v32 = vadd.f32 %v417_v26, %v416_v21 }
  0x80   :  { %v276_v9 = vadd.f32 %v228_v1, %v647_v22  ;;  %v423_v1 = vsel %vm379_vm2, %v548_v17, 0.0 }
  0x81   :  { %v424_v10 = vadd.f32 %v423_v1, %v422_v27  ;;  %553 = vlog2.f32 %v418_v32 }
  0x82   :  { %v163_v41 = vpop.permute.xlu1 %162  ;;  %v770_v43 = vpop.permute.xlu0 %131  ;;  %v284_v25 = vadd.f32 %v276_v9, %v647_v22 }
  0x83   :  { %v187_v24 = vsel %vm186_vm4, %v163_v41, 0.0  ;;  %v285_v41 = vadd.f32 %v277_v12, %v635_v13  ;;  %v155_v47 = vsel %vm153_vm3, 0.0, %v770_v43 }
  0x84   :  { %v267_v46 = vsub.f32 %v187_v24, %v154_v37 }
  0x86   :  { %v210_v50 = vpop.permute.xlu1 %209  ;;  %v165_v52 = vpop.permute.xlu0 %164  ;;  %v299_v6 = vmul.f32 %v267_v46, %v267_v46 }
  0x87   :  { %v230_v14 = vsel %vm153_vm3, 0.0, %v210_v50  ;;  %v188_v30 = vsel %vm186_vm4, %v165_v52, 0.0  ;;  %v550_v52 = vpop.eup %549 }
  0x88   :  { %v278_v28 = vadd.f32 %v230_v14, %v656_v29  ;;  %v268_v55 = vsub.f32 %v188_v30, %v155_v47  ;;  %v552_v58 = vpop.eup %551  ;;  %v425_v11 = vsel %vm379_vm2, %v550_v52, 0.0 }
  0x8a   :  { %v238_v56 = vpop.permute.xlu1 %237  ;;  %v236_v57 = vpop.permute.xlu0 %235  ;;  %v286_v0 = vadd.f32 %v278_v28, %v656_v29  ;;  %v300_v9 = vmul.f32 %v268_v55, %v268_v55  ;;  %v426_v29 = vsel %vm379_vm2, %v552_v58, 0.0 }
  0x8b   :  { %v259_v15 = vsel %vm186_vm4, %v236_v57, 0.0  ;;  %v260_v19 = vsel %vm186_vm4, %v238_v56, 0.0  ;;  %v421_v57 = vadd.f32 %v420_v36, %v419_v23  ;;  %v427_v26 = vadd.f32 %v426_v29, %v425_v11 }
  0x8c   :  { %v291_v33 = vadd.f32 %v283_v20, %v259_v15  ;;  %v292_v40 = vadd.f32 %v284_v25, %v260_v19 }
  0x8d   :  { %555 = vlog2.f32 %v421_v57 }
  0x8e   :  { %v167_v60 = vpop.permute.xlu1 %166  ;;  %v134_v61 = vpop.permute.xlu0 %133  ;;  %v307_v13 = vmul.f32 %v291_v33, %v291_v33  ;;  %v308_v2 = vmul.f32 %v292_v40, %v292_v40  ;;  %557 = vlog2.f32 %v424_v10 }
  0x8f   :  { %v189_v49 = vsel %vm186_vm4, %v167_v60, 0.0  ;;  %v156_v50 = vsel %vm153_vm3, 0.0, %v134_v61  ;;  %v554_v57 = vpop.eup %553 }
  0x90   :  { %v820_v12 = vadd.f32 %v307_v13, %v299_v6  ;;  %v855_v10 = vmul.f32 0.6931472, %v554_v57 }
  0x92   :  { %v240_v3 = vpop.permute.xlu1 %239  ;;  %v212_v4 = vpop.permute.xlu0 %211  ;;  %559 = vrsqrt.f32 %v820_v12  ;;  %vm325_vm5 = vcmp.eq.f32.partialorder %v820_v12, inf  ;;  %vm327_vm7 = vcmp.eq.f32.partialorder %v820_v12, 0.0 }
  0x93   :  { %v261_v22 = vsel %vm186_vm4, %v240_v3, 0.0  ;;  %v269_v3 = vsub.f32 %v189_v49, %v156_v50  ;;  %v231_v7 = vsel %vm153_vm3, 0.0, %v212_v4 }
  0x94   :  { %v293_v59 = vadd.f32 %v285_v41, %v261_v22  ;;  %v279_v19 = vadd.f32 %v231_v7, %v678_v42 }
  0x96   :  { %v169_v16 = vpop.permute.xlu1 %168  ;;  %v136_v18 = vpop.permute.xlu0 %135  ;;  %v309_v14 = vmul.f32 %v293_v59, %v293_v59  ;;  %v287_v17 = vadd.f32 %v279_v19, %v678_v42 }
  0x97   :  { %v190_v43 = vsel %vm186_vm4, %v169_v16, 0.0  ;;  %v157_v60 = vsel %vm153_vm3, 0.0, %v136_v18  ;;  %v822_v16 = vadd.f32 %v308_v2, %v300_v9  ;;  %v301_v18 = vmul.f32 %v269_v3, %v269_v3 }
  0x98   :  { %v270_v15 = vsub.f32 %v190_v43, %v157_v60 }
  0x99   :  { %v829_v27 = vadd.f32 %v309_v14, %v301_v18  ;;  %561 = vrsqrt.f32 %v822_v16  ;;  %vm332_vm6 = vcmp.eq.f32.partialorder %v822_v16, inf  ;;  %vm334_vm9 = vcmp.eq.f32.partialorder %v822_v16, 0.0 }
  0x9a   :  { %v242_v44 = vpop.permute.xlu1 %241  ;;  %v214_v45 = vpop.permute.xlu0 %213  ;;  %v302_v28 = vmul.f32 %v270_v15, %v270_v15  ;;  %563 = vlog2.f32 %v427_v26 }
  0x9b   :  { %v262_v56 = vsel %vm186_vm4, %v242_v44, 0.0  ;;  %v232_v23 = vsel %vm153_vm3, 0.0, %v214_v45  ;;  %565 = vrsqrt.f32 %v829_v27  ;;  %v556_v1 = vpop.eup %555  ;;  %vm339_vm8 = vcmp.eq.f32.partialorder %v829_v27, inf }
  0x9c   :  { %v294_v8 = vadd.f32 %v286_v0, %v262_v56  ;;  %v280_v30 = vadd.f32 %v232_v23, %v691_v51  ;;  %v558_v43 = vpop.eup %557  ;;  %v857_v29 = vmul.f32 0.6931472, %v556_v1  ;;  %vm341_vm11 = vcmp.eq.f32.partialorder %v829_v27, 0.0 }
  0x9e   :  { %v171_v61 = vpop.permute.xlu1 %170  ;;  %v138_v5 = vpop.permute.xlu0 %137  ;;  %v310_v4 = vmul.f32 %v294_v8, %v294_v8  ;;  %v288_v47 = vadd.f32 %v280_v30, %v691_v51 }
  0x9f   :  { %v191_v24 = vsel %vm186_vm4, %v171_v61, 0.0  ;;  %v158_v25 = vsel %vm153_vm3, 0.0, %v138_v5  ;;  %v560_v60 = vpop.eup %559 }
  0xa0   :  { %v271_v33 = vsub.f32 %v191_v24, %v158_v25  ;;  %v834_v40 = vadd.f32 %v310_v4, %v302_v28  ;;  %v324_v19 = vmul.f32 %v560_v60, %v820_v12 }
  0xa2   :  { %v218_v20 = vpop.permute.xlu1 %217  ;;  %v216_v21 = vpop.permute.xlu0 %215  ;;  %v303_v44 = vmul.f32 %v271_v33, %v271_v33  ;;  %567 = vrsqrt.f32 %v834_v40  ;;  %vm346_vm10 = vcmp.eq.f32.partialorder %v834_v40, inf  ;;  %vm348_vm12 = vcmp.eq.f32.partialorder %v834_v40, 0.0 }
  0xa3   :  { %v234_v51 = vsel %vm153_vm3, 0.0, %v218_v20  ;;  %v233_v2 = vsel %vm153_vm3, 0.0, %v216_v21  ;;  %v862_v20 = vmul.f32 0.6931472, %v558_v43  ;;  %v349_v43 = vand.u32 2147483648, %v834_v40 }
  0xa4   :  { %v282_v61 = vadd.f32 %v234_v51, %v703_v62  ;;  %v281_v5 = vadd.f32 %v233_v2, %v705_v63 }
  0xa6   :  { %v140_v36 = vpop.permute.xlu1 %139  ;;  %v244_v37 = vpop.permute.xlu0 %243  ;;  %v290_v24 = vadd.f32 %v282_v61, %v703_v62  ;;  %v289_v26 = vadd.f32 %v281_v5, %v705_v63  ;;  %v326_v62 = vsel %vm325_vm5, %v820_v12, %v324_v19 }
  0xa7   :  { %v263_v41 = vsel %vm186_vm4, %v244_v37, 0.0  ;;  %v159_v42 = vsel %vm153_vm3, 0.0, %v140_v36  ;;  %v562_v11 = vpop.eup %561 }
  0xa8   :  { %v295_v22 = vadd.f32 %v287_v17, %v263_v41  ;;  %v564_v14 = vpop.eup %563  ;;  %v331_v36 = vmul.f32 %v562_v11, %v822_v16  ;;  %v436_v17 = vsub.f32 %v755_v31, %v855_v10 }
  0xa9   :  { %v566_v21 = vpop.eup %565 }
  0xaa   :  { %v311_v45 = vmul.f32 %v295_v22, %v295_v22  ;;  %v246_v46 = vpop.permute.xlu1 %245  ;;  %v173_v49 = vpop.permute.xlu0 %172  ;;  %v338_v63 = vmul.f32 %v566_v21, %v829_v27  ;;  %v441_v21 = vsub.f32 %v767_v39, %v857_v29 }
  0xab   :  { %v264_v50 = vsel %vm186_vm4, %v246_v46, 0.0  ;;  %v192_v52 = vsel %vm186_vm4, %v173_v49, 0.0 }
  0xac   :  { %v843_v55 = vadd.f32 %v311_v45, %v303_v44  ;;  %v296_v56 = vadd.f32 %v288_v47, %v264_v50  ;;  %v272_v32 = vsub.f32 %v192_v52, %v159_v42  ;;  %v872_v44 = vmul.f32 0.6931472, %v564_v14 }
  0xad   :  { %v437_v45 = vsub.f32 %v759_v34, %v857_v29  ;;  %v328_v42 = vand.u32 2147483648, %v820_v12  ;;  %v333_v50 = vsel %vm332_vm6, %v822_v16, %v331_v36  ;;  %v438_v12 = vsub.f32 %v761_v35, %v862_v20 }
  0xae   :  { %v312_v58 = vmul.f32 %v296_v56, %v296_v56  ;;  %v304_v13 = vmul.f32 %v272_v32, %v272_v32  ;;  %v144_v59 = vpop.permute.xlu1 %143  ;;  %v142_v0 = vpop.permute.xlu0 %141  ;;  %569 = vrsqrt.f32 %v843_v55  ;;  %v439_v61 = vsub.f32 %v778_v53, %v872_v44 }
  0xaf   :  { %v161_v15 = vsel %vm153_vm3, 0.0, %v144_v59  ;;  %v160_v18 = vsel %vm153_vm3, 0.0, %v142_v0  ;;  %v568_v37 = vpop.eup %567  ;;  %v329_v34 = vsel %vm327_vm7, %v328_v42, %v326_v62  ;;  %v342_v0 = vand.u32 2147483648, %v829_v27 }
  0xb0   :  { %v848_v3 = vadd.f32 %v312_v58, %v304_v13  ;;  %v345_v52 = vmul.f32 %v568_v37, %v834_v40  ;;  %v335_v58 = vand.u32 2147483648, %v822_v16  ;;  %v340_v13 = vsel %vm339_vm8, %v829_v27, %v338_v63 }
  0xb1   :  { %v343_v2 = vsel %vm341_vm11, %v342_v0, %v340_v13  ;;  %v444_v35 = vmul.f32 %v436_v17, %v329_v34  ;;  %vm353_vm13 = vcmp.eq.f32.partialorder %v843_v55, inf  ;;  %vm355_vm15 = vcmp.eq.f32.partialorder %v843_v55, 0.0 }
  0xb2   :  { %571 = vrsqrt.f32 %v848_v3  ;;  %v177_v6 = vpop.permute.xlu1 %176  ;;  %v175_v7 = vpop.permute.xlu0 %174  ;;  %v336_v59 = vsel %vm334_vm9, %v335_v58, %v333_v50  ;;  %v347_v51 = vsel %vm346_vm10, %v834_v40, %v345_v52  ;;  %vm360_vm14 = vcmp.eq.f32.partialorder %v848_v3, inf }
  0xb3   :  { %v194_v8 = vsel %vm186_vm4, %v177_v6, 0.0  ;;  %v193_v9 = vsel %vm186_vm4, %v175_v7, 0.0  ;;  %v445_v5 = vmul.f32 %v437_v45, %v336_v59  ;;  %v350_v6 = vsel %vm348_vm12, %v349_v43, %v347_v51 }
  0xb4   :  { %v274_v4 = vsub.f32 %v194_v8, %v161_v15  ;;  %v273_v23 = vsub.f32 %v193_v9, %v160_v18  ;;  %v446_v7 = vmul.f32 %v438_v12, %v343_v2  ;;  %v356_v8 = vand.u32 2147483648, %v843_v55 }
  0xb5   :  { %v440_v9 = vsub.f32 %v765_v38, %v855_v10  ;;  %v452_v40 = vsel %vm379_vm2, %v444_v35, 0.0  ;;  %v447_v11 = vmul.f32 %v439_v61, %v350_v6  ;;  %v453_v14 = vsel %vm379_vm2, %v445_v5, 0.0 }
  0xb6   :  { %v250_v25 = vpop.permute.xlu1 %249  ;;  %v248_v28 = vpop.permute.xlu0 %247  ;;  %v306_v46 = vmul.f32 %v274_v4, %v274_v4  ;;  %v305_v47 = vmul.f32 %v273_v23, %v273_v23  ;;  %v363_v18 = vand.u32 2147483648, %v848_v3  ;;  %vm362_vm0 = vcmp.eq.f32.partialorder %v848_v3, 0.0 }
  0xb7   :  { %v266_v30 = vsel %vm186_vm4, %v250_v25, 0.0  ;;  %v265_v33 = vsel %vm186_vm4, %v248_v28, 0.0  ;;  %v455_v19 = vsel %vm379_vm2, %v446_v7, 0.0  ;;  %v454_v10 = vadd.f32 %v453_v14, %v452_v40 }
  0xb8   :  { %v298_v41 = vadd.f32 %v290_v24, %v266_v30  ;;  %v297_v22 = vadd.f32 %v289_v26, %v265_v33  ;;  %v476_v23 = vsel %vm379_vm2, %v329_v34, -inf  ;;  %v442_v24 = vsub.f32 %v775_v48, %v862_v20 }
  0xb9   :  { %v443_v25 = vsub.f32 %v780_v54, %v872_v44  ;;  %v456_v26 = vadd.f32 %v455_v19, %v454_v10  ;;  %v477_v28 = vsel %vm379_vm2, %v336_v59, -inf  ;;  %v478_v30 = vsel %vm379_vm2, %v343_v2, -inf }
  0xba   :  { %v314_v49 = vmul.f32 %v298_v41, %v298_v41  ;;  %v313_v31 = vmul.f32 %v297_v22, %v297_v22  ;;  %v479_v39 = vsel %vm379_vm2, %v350_v6, -inf }
  0xbb   :  { %v570_v56 = vpop.eup %569 }
  0xbc   :  { %v883_v32 = vadd.f32 %v314_v49, %v306_v46  ;;  %v885_v57 = vadd.f32 %v313_v31, %v305_v47  ;;  %v352_v16 = vmul.f32 %v570_v56, %v843_v55 }
  0xbe   :  { %573 = vrsqrt.f32 %v883_v32  ;;  %v354_v27 = vsel %vm353_vm13, %v843_v55, %v352_v16  ;;  %v457_v55 = vsel %vm379_vm2, %v447_v11, 0.0  ;;  %vm367_vm1 = vcmp.eq.f32.partialorder %v885_v57, inf }
  0xbf   :  { %v572_v1 = vpop.eup %571  ;;  %575 = vrsqrt.f32 %v885_v57  ;;  %v357_v15 = vsel %vm355_vm15, %v356_v8, %v354_v27  ;;  %vm374_vm3 = vcmp.eq.f32.partialorder %v883_v32, inf  ;;  %v458_v48 = vadd.f32 %v457_v55, %v456_v26 }
  0xc0   :  { %v359_v60 = vmul.f32 %v572_v1, %v848_v3  ;;  %v448_v4 = vmul.f32 %v440_v9, %v357_v15  ;;  %v377_v54 = vand.u32 2147483648, %v883_v32  ;;  %vm369_vm4 = vcmp.eq.f32.partialorder %v885_v57, 0.0 }
  0xc1   :  { %v370_v41 = vand.u32 2147483648, %v885_v57  ;;  %vm376_vm5 = vcmp.eq.f32.partialorder %v883_v32, 0.0  ;;  %v480_v63 = vsel %vm379_vm2, %v357_v15, -inf }
  0xc2   :  { %v361_v53 = vsel %vm360_vm14, %v848_v3, %v359_v60  ;;  %v459_v37 = vsel %vm379_vm2, %v448_v4, 0.0  ;;  %v481_v58 = vmax.f32 %v476_v23, %v480_v63 }
  0xc3   :  { %v364_v38 = vsel %vm362_vm0, %v363_v18, %v361_v53  ;;  %v460_v31 = vadd.f32 %v459_v37, %v458_v48 }
  0xc4   :  { %v449_v29 = vmul.f32 %v441_v21, %v364_v38  ;;  %v482_v17 = vsel %vm379_vm2, %v364_v38, -inf }
  0xc5   :  { %v483_v47 = vmax.f32 %v477_v28, %v482_v17 }
  0xc6   :  { %v461_v45 = vsel %vm379_vm2, %v449_v29, 0.0 }
  0xc7   :  { %v488_v13 = vmax.f32 %v481_v58, %v483_v47 }
  0xcb   :  { %v574_v3 = vpop.eup %573 }
  0xcc   :  { %v576_v33 = vpop.eup %575  ;;  %v373_v36 = vmul.f32 %v574_v3, %v883_v32 }
  0xcd   :  { %v366_v20 = vmul.f32 %v576_v33, %v885_v57 }
  0xce   :  { %v375_v22 = vsel %vm374_vm3, %v883_v32, %v373_v36  ;;  %v462_v32 = vadd.f32 %v461_v45, %v460_v31 }
  0xcf   :  { %v368_v44 = vsel %vm367_vm1, %v885_v57, %v366_v20  ;;  %v378_v62 = vsel %vm376_vm5, %v377_v54, %v375_v22 }
  0xd0   :  { %v371_v46 = vsel %vm369_vm4, %v370_v41, %v368_v44  ;;  %v486_v49 = vsel %vm379_vm2, %v378_v62, -inf  ;;  %v451_v56 = vmul.f32 %v443_v25, %v378_v62 }
  0xd1   :  { %v484_v42 = vsel %vm379_vm2, %v371_v46, -inf  ;;  %v487_v50 = vmax.f32 %v479_v39, %v486_v49  ;;  %v450_v52 = vmul.f32 %v442_v24, %v371_v46 }
  0xd2   :  { %v485_v34 = vmax.f32 %v478_v30, %v484_v42  ;;  %v465_v0 = vsel %vm379_vm2, %v451_v56, 0.0 }
  0xd3   :  { %v463_v57 = vsel %vm379_vm2, %v450_v52, 0.0 }
  0xd4   :  { %v489_v12 = vmax.f32 %v485_v34, %v487_v50  ;;  %v464_v59 = vadd.f32 %v463_v57, %v462_v32 }
  0xd6   :  { %v490_v1 = vmax.f32 %v488_v13, %v489_v12  ;;  %v466_v51 = vadd.f32 %v465_v0, %v464_v59 }
  0xd8   :  { %491 = vmax.xlane.f32.xlu1 %v490_v1  ;;  %467 = vadd.xlane.f32.xlu0 %v466_v51 }
 0x161   :  { %v492_v16 = vpop.xlane.xlu1 %491  ;;  %v468_v2 = vpop.xlane.xlu0 %467 }
 0x162   :  { %v493_v43 = vrot.slane %v492_v16, 4  ;;  %v469_v35 = vrot.slane %v468_v2, 4 }
 0x164   :  { %v494_v60 = vmax.f32 %v492_v16, %v493_v43  ;;  %v470_v61 = vadd.f32 %v469_v35, %v468_v2 }
 0x166   :  { %v495_v5 = vrot.slane %v494_v60, 2  ;;  %v471_v6 = vrot.slane %v470_v61, 2 }
 0x168   :  { %v496_v27 = vmax.f32 %v494_v60, %v495_v5  ;;  %v472_v7 = vadd.f32 %v471_v6, %v470_v61 }
 0x16a   :  { %v473_v8 = vrot.slane %v472_v7, 1  ;;  %v497_v9 = vrot.slane %v496_v27, 1 }
 0x16c   :  { %v474_v40 = vadd.f32 %v473_v8, %v472_v7  ;;  %v498_v53 = vmax.f32 %v496_v27, %v497_v9 }
 0x16e   :  { %529 = vpush %v474_v40 }
 0x16f   :  { %531 = vpush %v498_v53 }
 0x19f   :  { %s530_s0 = spop %529 }
 0x1a0   :  { %s532_s18 = spop %531  ;;  %501 = sst [smem:[#allocation2]] %s530_s0 }
 0x1a1   :  { %503 = sst [smem:[#allocation4]] %s532_s18 }
 0x1a2   :  { %511 = dma.smem_to_hbm %s599_s19, 16, %s955_s2, [#allocation3]  }
 0x1a3   :  { %519 = dma.smem_to_hbm %s600_s22, 16, %s956_s3, [#allocation5]  }
 0x1a4   :  { %593 = dma.done.wait [#allocation3], 16  }
 0x1a5   :  { %594 = vsyncadd [#allocation3], 4294967280 }
 0x1a6   :  { %595 = dma.done.wait [#allocation5], 16  }
 0x1a7   :  { %596 = vsyncadd [#allocation5], 4294967280 }
 0x1a8   :  { %526 = sfence }
 0x1a9   :  { %527 = vsyncpa [#allocation3], 1 }
 0x1aa   :  { %528 = vsyncpa [#allocation5], 1 }

</bundles_post_ra>
